<compile_context>
chip_gen: v6e
topology: v6e:2x2x1
jax: 0.10.0
libtpu: 0.0.40
codegen_flags: <defaults>
</compile_context>

<pallas_src>
import functools

import jax
import jax.numpy as jnp
from jax.experimental import pallas as pl
from jax.experimental.pallas import tpu as pltpu


def _round_up(v: int, m: int) -> int:
    return ((v + m - 1) // m) * m


def _pick_tile(dim: int, align: int, max_tile: int, pow2_candidates) -> int:
    """Pick a tile (multiple of `align`, <= max_tile) minimizing padding waste.

    Candidates are the usual power-of-two sizes plus the fully aligned problem
    dim itself (so batch=300 can use tm=304 / one M block instead of padding to
    512).  Ties go to the larger tile (fewer grid steps, fewer re-streams).
    """
    dim_pad = _round_up(dim, align)
    cands = {c for c in pow2_candidates if align <= c <= max_tile}
    if dim_pad <= max_tile:
        cands.add(dim_pad)
    if not cands:
        cands = {align}
    best, best_pad = None, None
    for c in sorted(cands):
        pad = _round_up(dim, c) - dim
        if best is None or pad < best_pad or (pad == best_pad and c > best):
            best, best_pad = c, pad
    return best


def _is_multi_tensorcore() -> bool:
    # v7x has 2 TensorCores per chip; v5e/v6e have 1.
    try:
        kind = jax.devices()[0].device_kind.lower()
        return ("v7" in kind) or ("7x" in kind)
    except Exception:
        return False


def _grouped_linear_kernel(x_ref, w_ref, b_ref, o_ref, acc_ref):
    # x_ref:  (tm, tk)   activation tile
    # w_ref:  (tn, tk)   weight tile, PyTorch (N, K) layout -- no transpose
    # b_ref:  (1, tn)    f32 bias tile
    # o_ref:  (tm, tn)   output tile (lane-dense on N)
    # acc_ref:(tm, tn)   f32 accumulator, resident across the K (last) grid axis
    k = pl.program_id(2)

    # x @ w.T on the MXU: contract the shared K (last) dims directly.
    prod = jax.lax.dot_general(
        x_ref[...],
        w_ref[...],
        dimension_numbers=(((1,), (1,)), ((), ())),
        preferred_element_type=jnp.float32,
    )

    @pl.when(k == 0)
    def _():
        # Fold the bias into the accumulator init: no zero-fill store and no
        # separate epilogue add.
        acc_ref[...] = prod + b_ref[...]

    @pl.when(k > 0)
    def _():
        acc_ref[...] += prod

    @pl.when(k == pl.num_programs(2) - 1)
    def _():
        o_ref[...] = acc_ref[...].astype(o_ref.dtype)


@functools.partial(
    jax.jit,
    static_argnames=("tm", "tn", "tk", "n_major", "compute_dtype", "weight_buffers"),
)
def _grouped_linear_impl(x, weight, bias, *, tm, tn, tk, n_major, compute_dtype,
                         weight_buffers):
    batch, in_features = x.shape
    out_features = weight.shape[0]
    out_dtype = x.dtype

    cdt = jnp.dtype(compute_dtype)
    if x.dtype != cdt:
        x = x.astype(cdt)
    if weight.dtype != cdt:
        weight = weight.astype(cdt)

    bp = _round_up(batch, tm)
    np_ = _round_up(out_features, tn)
    kp = _round_up(in_features, tk)

    # Pad only when a dim is not already tile aligned (no padding op otherwise).
    if bp != batch or kp != in_features:
        x = jnp.pad(x, ((0, bp - batch), (0, kp - in_features)))
    if np_ != out_features or kp != in_features:
        weight = jnp.pad(weight, ((0, np_ - out_features), (0, kp - in_features)))
    bias_f32 = bias.astype(jnp.float32)
    if np_ != out_features:
        bias_f32 = jnp.pad(bias_f32, (0, np_ - out_features))
    bias2d = bias_f32.reshape(1, np_)

    grid_m, grid_n, grid_k = bp // tm, np_ // tn, kp // tk

    # Larger parallel axis first (megacore sharding gets extent >= 2 on its
    # leading dim); K is always the innermost "arbitrary" reduction axis.
    if n_major:
        grid = (grid_n, grid_m, grid_k)
        x_map = lambda j, i, k: (i, k)
        w_map = lambda j, i, k: (j, k)
        b_map = lambda j, i, k: (0, j)
        o_map = lambda j, i, k: (i, j)
    else:
        grid = (grid_m, grid_n, grid_k)
        x_map = lambda i, j, k: (i, k)
        w_map = lambda i, j, k: (j, k)
        b_map = lambda i, j, k: (0, j)
        o_map = lambda i, j, k: (i, j)

    w_spec_kwargs = {}
    if weight_buffers is not None:
        # Optional deeper pipelining on the largest streamed operand; only
        # enable after profiling shows exposed weight DMA.
        w_spec_kwargs["pipeline_mode"] = pl.Buffered(weight_buffers)

    # VMEM budget from the actual buffers: double-buffered x/W/bias/out tiles
    # plus the f32 accumulator, with headroom, capped below v7x's 64 MiB.
    c_bytes = cdt.itemsize
    o_bytes = jnp.dtype(out_dtype).itemsize
    tile_bytes = tm * tk * c_bytes + tn * tk * c_bytes + tn * 4 + tm * tn * o_bytes
    vmem_needed = 2 * tile_bytes + tm * tn * 4
    vmem_limit = int(min(48 * 1024 * 1024, max(2 * vmem_needed, 16 * 1024 * 1024)))

    cost = pl.CostEstimate(
        flops=2 * bp * np_ * kp,
        transcendentals=0,
        bytes_accessed=(bp * kp * c_bytes + np_ * kp * c_bytes
                        + np_ * 4 + bp * np_ * o_bytes),
    )

    out_padded = pl.pallas_call(
        _grouped_linear_kernel,
        out_shape=jax.ShapeDtypeStruct((bp, np_), out_dtype),
        grid_spec=pltpu.PrefetchScalarGridSpec(
            num_scalar_prefetch=0,
            grid=grid,
            in_specs=[
                pl.BlockSpec((tm, tk), x_map),
                pl.BlockSpec((tn, tk), w_map, **w_spec_kwargs),
                pl.BlockSpec((1, tn), b_map),
            ],
            out_specs=pl.BlockSpec((tm, tn), o_map),
            scratch_shapes=[pltpu.VMEM((tm, tn), jnp.float32)],
        ),
        compiler_params=pltpu.CompilerParams(
            dimension_semantics=("parallel", "parallel", "arbitrary"),
            vmem_limit_bytes=vmem_limit,
        ),
        cost_estimate=cost,
    )(x, weight, bias2d)

    if bp != batch or np_ != out_features:
        out_padded = out_padded[:batch, :out_features]
    return out_padded


def grouped_linear_forward(x, weight, bias, *, tile_m: int = 512,
                           tile_n: int = 1024, tile_k: int = 2048,
                           compute_dtype=None, weight_buffers=None):
    """Pallas implementation of F.linear(x, weight, bias).

    x:      [batch, in_features]
    weight: [out_features, in_features]   (PyTorch convention, used as-is)
    bias:   [out_features]
    """
    batch, in_features = x.shape
    out_features, in_features_w = weight.shape
    assert in_features_w == in_features
    assert bias.shape == (out_features,)

    # bf16 operands by default for f32 inputs (MXU-native on every generation);
    # accumulation and the bias epilogue stay f32 inside the kernel.
    if compute_dtype is None:
        compute_dtype = jnp.bfloat16 if x.dtype == jnp.dtype(jnp.float32) else x.dtype
    cdt = jnp.dtype(compute_dtype)
    # TODO(synk): optional fp8 weight path (bf16 activations x fp8 weights) for
    # weight-bandwidth-bound inference on v7x; needs a quality-gated quantizer.

    # Sublane multiple for the M axis by operand dtype width.
    sub = 8 if cdt.itemsize >= 4 else (16 if cdt.itemsize == 2 else 32)

    tm = _pick_tile(batch, sub, max(sub, tile_m), (128, 256, 512))
    tn = _pick_tile(out_features, 128, max(128, tile_n), (128, 256, 512, 1024))
    tk = _pick_tile(in_features, 128, max(128, tile_k), (128, 256, 512, 1024, 2048))

    bp = _round_up(batch, tm)
    np_ = _round_up(out_features, tn)
    grid_m, grid_n = bp // tm, np_ // tn

    # On multi-TensorCore chips (v7x), make sure both cores get work when the
    # parallel grid would otherwise collapse to a single block.
    if _is_multi_tensorcore() and grid_m == 1 and grid_n == 1 and tn >= 256:
        tn = max(128, _round_up(tn // 2, 128))
        np_ = _round_up(out_features, tn)
        grid_n = np_ // tn

    n_major = grid_n >= grid_m

    return _grouped_linear_impl(
        x, weight, bias,
        tm=tm, tn=tn, tk=tk, n_major=n_major,
        compute_dtype=cdt, weight_buffers=weight_buffers,
    )


if __name__ == "__main__":
    # Small shapes consistent with the module: a toy linear layer.
    batch, in_features, out_features = 8, 32, 16

    key = jax.random.PRNGKey(0)
    kx, kw, kb = jax.random.split(key, 3)
    x = jax.random.normal(kx, (batch, in_features), dtype=jnp.float32)
    weight = jax.random.normal(kw, (out_features, in_features), dtype=jnp.float32)
    bias = jax.random.normal(kb, (out_features,), dtype=jnp.float32)

    # Group assignments / masks only affect gradient post-processing, not the
    # forward pass; constructed here only to mirror the module.
    group_assignments = {
        "fast_learners": [0, 1, 2, 3],
        "slow_learners": [4, 5, 6, 7],
    }
    group_masks = {
        name: jnp.zeros((out_features,), dtype=bool).at[jnp.array(idx)].set(True)
        for name, idx in group_assignments.items()
    }
    # TODO(synk): apply_group_gradients mutates .grad in-place during training;
    # it has no forward-pass equivalent, so it is not part of the kernel.

    # 1) exact f32 operand path (reference-identical).
    out_f32 = jax.block_until_ready(
        grouped_linear_forward(x, weight, bias, compute_dtype=jnp.float32))
    ref_f32 = x @ weight.T + bias
    assert out_f32.shape == (batch, out_features)
    assert jnp.allclose(out_f32, ref_f32, atol=1e-5, rtol=1e-5)

    # 2) default path (bf16 operands, f32 accumulation) vs bf16-operand ref.
    out_bf16 = jax.block_until_ready(grouped_linear_forward(x, weight, bias))
    ref_bf16 = jnp.dot(x.astype(jnp.bfloat16), weight.astype(jnp.bfloat16).T,
                       preferred_element_type=jnp.float32) + bias
    assert jnp.allclose(out_bf16, ref_bf16, atol=1e-2, rtol=1e-2)

    # 3) non-tile-aligned, genuinely tiled problem (padding + grid path).
    kx2, kw2, kb2 = jax.random.split(jax.random.PRNGKey(1), 3)
    b2, k2, n2 = 300, 640, 384
    x2 = jax.random.normal(kx2, (b2, k2), dtype=jnp.float32)
    w2 = jax.random.normal(kw2, (n2, k2), dtype=jnp.float32)
    bb2 = jax.random.normal(kb2, (n2,), dtype=jnp.float32)
    out2 = jax.block_until_ready(grouped_linear_forward(x2, w2, bb2))
    ref2 = jnp.dot(x2.astype(jnp.bfloat16), w2.astype(jnp.bfloat16).T,
                   preferred_element_type=jnp.float32) + bb2
    assert out2.shape == (b2, n2)
    assert jnp.allclose(out2, ref2, atol=5e-2, rtol=5e-2)

    print("KERNEL_OK")
</pallas_src>

<mosaic_0001>
module attributes {stable_mosaic.version = 11 : i64} {
  func.func @_grouped_linear_kernel(%arg0: i32, %arg1: i32, %arg2: i32, %arg3: memref<8x128xf32, #tpu.memory_space<vmem>>, %arg4: memref<128x128xf32, #tpu.memory_space<vmem>>, %arg5: memref<1x128xf32, #tpu.memory_space<vmem>>, %arg6: memref<8x128xf32, #tpu.memory_space<vmem>>, %arg7: memref<8x128xf32, #tpu.memory_space<vmem>>) attributes {dimension_semantics = [#tpu.dimension_semantics<parallel>, #tpu.dimension_semantics<parallel>, #tpu.dimension_semantics<arbitrary>], iteration_bounds = array<i64: 1, 1, 1>, scalar_prefetch = 0 : i64, scratch_operands = 1 : i64, tpu.core_type = #tpu.core_type<tc>, window_params = [{transform_indices = @transform_0, window_bounds = array<i64: 8, 128>}, {transform_indices = @transform_1, window_bounds = array<i64: 128, 128>}, {transform_indices = @transform_2, window_bounds = array<i64: 1, 128>}, {transform_indices = @transform_3, window_bounds = array<i64: 8, 128>}]} {
    %c0 = arith.constant 0 : index
    %c0_0 = arith.constant 0 : index
    %0 = vector.load %arg3[%c0, %c0_0] : memref<8x128xf32, #tpu.memory_space<vmem>>, vector<8x128xf32>
    %c0_1 = arith.constant 0 : index
    %c0_2 = arith.constant 0 : index
    %1 = vector.load %arg4[%c0_1, %c0_2] : memref<128x128xf32, #tpu.memory_space<vmem>>, vector<128x128xf32>
    %cst = arith.constant dense<0.000000e+00> : vector<8x128xf32>
    %2 = tpu.matmul %0, %1, %cst {dimension_numbers = #tpu.dot_dimension_numbers<[1], [1], [0], [0], [0, 0, 1, 0], [], []>} : vector<8x128xf32>, vector<128x128xf32>, vector<8x128xf32> -> vector<8x128xf32>
    %c0_i32 = arith.constant 0 : i32
    %3 = arith.cmpi eq, %arg2, %c0_i32 : i32
    %4 = arith.extui %3 : i1 to i32
    %c0_i32_3 = arith.constant 0 : i32
    %5 = arith.cmpi ne, %4, %c0_i32_3 : i32
    scf.if %5 {
      %c0_8 = arith.constant 0 : index
      %c0_9 = arith.constant 0 : index
      %12 = vector.load %arg5[%c0_8, %c0_9] : memref<1x128xf32, #tpu.memory_space<vmem>>, vector<1x128xf32>
      %13 = vector.broadcast %12 : vector<1x128xf32> to vector<8x128xf32>
      %14 = arith.addf %2, %13 : vector<8x128xf32>
      %c0_10 = arith.constant 0 : index
      %c0_11 = arith.constant 0 : index
      %15 = vector.load %arg7[%c0_10, %c0_11] : memref<8x128xf32, #tpu.memory_space<vmem>>, vector<8x128xf32>
      tpu.vector_store %arg7[%c0_10, %c0_11], %14 {strides = array<i32>} : memref<8x128xf32, #tpu.memory_space<vmem>>, vector<8x128xf32>,
    } else {
    }
    %c0_i32_4 = arith.constant 0 : i32
    %6 = arith.cmpi sgt, %arg2, %c0_i32_4 : i32
    %7 = arith.extui %6 : i1 to i32
    %c0_i32_5 = arith.constant 0 : i32
    %8 = arith.cmpi ne, %7, %c0_i32_5 : i32
    scf.if %8 {
      %c0_8 = arith.constant 0 : index
      %c0_9 = arith.constant 0 : index
      %12 = vector.load %arg7[%c0_8, %c0_9] : memref<8x128xf32, #tpu.memory_space<vmem>>, vector<8x128xf32>
      %13 = arith.addf %12, %2 : vector<8x128xf32>
      %c0_10 = arith.constant 0 : index
      %c0_11 = arith.constant 0 : index
      %14 = vector.load %arg7[%c0_10, %c0_11] : memref<8x128xf32, #tpu.memory_space<vmem>>, vector<8x128xf32>
      tpu.vector_store %arg7[%c0_10, %c0_11], %13 {strides = array<i32>} : memref<8x128xf32, #tpu.memory_space<vmem>>, vector<8x128xf32>,
    } else {
    }
    %c0_i32_6 = arith.constant 0 : i32
    %9 = arith.cmpi eq, %arg2, %c0_i32_6 : i32
    %10 = arith.extui %9 : i1 to i32
    %c0_i32_7 = arith.constant 0 : i32
    %11 = arith.cmpi ne, %10, %c0_i32_7 : i32
    scf.if %11 {
      %c0_8 = arith.constant 0 : index
      %c0_9 = arith.constant 0 : index
      %12 = vector.load %arg7[%c0_8, %c0_9] : memref<8x128xf32, #tpu.memory_space<vmem>>, vector<8x128xf32>
      %c0_10 = arith.constant 0 : index
      %c0_11 = arith.constant 0 : index
      %13 = vector.load %arg6[%c0_10, %c0_11] : memref<8x128xf32, #tpu.memory_space<vmem>>, vector<8x128xf32>
      tpu.vector_store %arg6[%c0_10, %c0_11], %12 {strides = array<i32>} : memref<8x128xf32, #tpu.memory_space<vmem>>, vector<8x128xf32>,
    } else {
    }
    return
  }
  func.func @transform_0(%arg0: i32, %arg1: i32, %arg2: i32) -> (i32, i32) {
    %c0_i32 = arith.constant 0 : i32
    return %arg1, %arg2 : i32, i32
  }
  func.func @transform_1(%arg0: i32, %arg1: i32, %arg2: i32) -> (i32, i32) {
    %c0_i32 = arith.constant 0 : i32
    return %arg0, %arg2 : i32, i32
  }
  func.func @transform_2(%arg0: i32, %arg1: i32, %arg2: i32) -> (i32, i32) {
    %c0_i32 = arith.constant 0 : i32
    %c0_i32_0 = arith.constant 0 : i32
    return %c0_i32, %arg0 : i32, i32
  }
  func.func @transform_3(%arg0: i32, %arg1: i32, %arg2: i32) -> (i32, i32) {
    %c0_i32 = arith.constant 0 : i32
    return %arg1, %arg0 : i32, i32
  }
}

</mosaic_0001>

<bundles_post_ra>
// kernel: _grouped_linear_impl.1
= control target key start
LH: loop header
LB: loop body
LE: loop exit
PB: predicated region body
PF: predicated region fallthrough
CT: control target
= control target key end

     0   :  { %v219_v1 = vmov 0.0   ;;  %vm220_vm0 = vmmov 0   ;;  %s299_s0 = inlined_call_operand.vmem [shape: f32[8,128], index: 0, kind: input, shape index: {}]   ;;  %s300_s1 = inlined_call_operand.vmem [shape: f32[128,128], index: 1, kind: input, shape index: {}]   ;;  %s301_s2 = inlined_call_operand.vmem [shape: f32[1,128], index: 2, kind: input, shape index: {}]   ;;  %s302_s3 = inlined_call_operand.hbm [shape: f32[8,128], index: 3, kind: output, shape index: {}]  }
   0x1   :  { %v31_v0 = vld [vmem:[%s300_s1 + $0x78] sm:$0xff]  ;;  %159 = vmatprep.subr.mxu0 %v219_v1  ;;  %191 = vmatprep.mubr.msk.f32.mxu0 %vm220_vm0, %v219_v1  ;;  %v30_v2 = vld [vmem:[%s300_s1 + $0x70] sm:$0xff] }
   0x2   :  { %160 = vmatpush3.xpose.msra.mxu0 %v31_v0 }
   0x3   :  { %161 = vmatprep.subr.mxu0 %v219_v1 }
   0x4   :  { %8 = vsyncpa [#allocation4], 0  ;;  %v29_v3 = vld [vmem:[%s300_s1 + $0x68] sm:$0xff]  ;;  %v28_v4 = vld [vmem:[%s300_s1 + $0x60] sm:$0xff]  ;;  %s221_s21 = smov [#allocation3]  }
   0x5   :  { %v27_v5 = vld [vmem:[%s300_s1 + $0x58] sm:$0xff]  ;;  %v26_v6 = vld [vmem:[%s300_s1 + $0x50] sm:$0xff]  ;;  %v25_v7 = vld [vmem:[%s300_s1 + $0x48] sm:$0xff]  ;;  %s133_s22 = sshll.u32 %s221_s21, 4  ;;  %s134_s22 = int_to_ptr.vmem [resolvable:$true] %s133_s22 }
   0x6   :  { %162 = vmatpush3.xpose.msra.mxu0 %v30_v2  ;;  %v24_v8 = vld [vmem:[%s300_s1 + $0x40] sm:$0xff]  ;;  %v23_v9 = vld [vmem:[%s300_s1 + $0x38] sm:$0xff]  ;;  %v22_v10 = vld [vmem:[%s300_s1 + $0x30] sm:$0xff]  ;;  %s197_s23 = scalar_lea.vmem %s134_s22, 128  ;;  %p202_p1 = scmp.lt.s32.totalorder %s134_s22, %s134_s22 }
   0x7   :  { %163 = vmatprep.subr.mxu0 %v219_v1  ;;  %v21_v11 = vld [vmem:[%s300_s1 + $0x28] sm:$0xff]  ;;  %v20_v12 = vld [vmem:[%s300_s1 + $0x20] sm:$0xff]  ;;  %v19_v13 = vld [vmem:[%s300_s1 + $0x18] sm:$0xff]  ;;  %p198_p0 = scmp.ne.s32.totalorder %s134_s22, %s197_s23  ;;  %p203_p2 = scmp.lt.s32.totalorder %s197_s23, %s197_s23 }
   0x8   :  { %v18_v14 = vld [vmem:[%s300_s1 + $0x10] sm:$0xff]  ;;  %v17_v15 = vld [vmem:[%s300_s1 + $0x8] sm:$0xff]  ;;  %v16_v16 = vld [vmem:[%s300_s1] sm:$0xff] }
   0x9   :  { %v15_v17 = vld [vmem:[%s299_s0] sm:$0xff]  ;;  %p204_p3 = por %p203_p2, %p202_p1 }
   0xa   :  { %164 = vmatpush3.xpose.msra.mxu0 %v29_v3  ;;  %v141_v18 = vld [vmem:[%s301_s2] ss:$0 sm:$0xff] }
   0xb   :  { %165 = vmatprep.subr.mxu0 %v219_v1  ;;  %p205_p4 = pnand %p204_p3, %p198_p0 }
   0xe   :  { %166 = vmatpush3.xpose.msra.mxu0 %v28_v4 }
   0xf   :  { %167 = vmatprep.subr.mxu0 %v219_v1 }
  0x12   :  { %168 = vmatpush3.xpose.msra.mxu0 %v27_v5 }
  0x13   :  { %169 = vmatprep.subr.mxu0 %v219_v1 }
  0x16   :  { %170 = vmatpush3.xpose.msra.mxu0 %v26_v6 }
  0x17   :  { %171 = vmatprep.subr.mxu0 %v219_v1 }
  0x1a   :  { %172 = vmatpush3.xpose.msra.mxu0 %v25_v7 }
  0x1b   :  { %173 = vmatprep.subr.mxu0 %v219_v1 }
  0x1e   :  { %174 = vmatpush3.xpose.msra.mxu0 %v24_v8 }
  0x1f   :  { %175 = vmatprep.subr.mxu0 %v219_v1 }
  0x22   :  { %176 = vmatpush3.xpose.msra.mxu0 %v23_v9 }
  0x23   :  { %177 = vmatprep.subr.mxu0 %v219_v1 }
  0x26   :  { %178 = vmatpush3.xpose.msra.mxu0 %v22_v10 }
  0x27   :  { %179 = vmatprep.subr.mxu0 %v219_v1 }
  0x2a   :  { %180 = vmatpush3.xpose.msra.mxu0 %v21_v11 }
  0x2b   :  { %181 = vmatprep.subr.mxu0 %v219_v1 }
  0x2e   :  { %182 = vmatpush3.xpose.msra.mxu0 %v20_v12 }
  0x2f   :  { %183 = vmatprep.subr.mxu0 %v219_v1 }
  0x32   :  { %184 = vmatpush3.xpose.msra.mxu0 %v19_v13 }
  0x33   :  { %185 = vmatprep.subr.mxu0 %v219_v1 }
  0x36   :  { %186 = vmatpush3.xpose.msra.mxu0 %v18_v14 }
  0x37   :  { %187 = vmatprep.subr.mxu0 %v219_v1 }
  0x3a   :  { %188 = vmatpush3.xpose.msra.mxu0 %v17_v15 }
  0x3b   :  { %189 = vmatprep.subr.mxu0 %v219_v1 }
  0x3e   :  { %190 = vmatpush3.xpose.msra.mxu0 %v16_v16 }
  0x41   :  { %192 = vmatmul.mubr.f32.vlgmr.msra.gmra.mxu0 %v15_v17 }
 0x101   :  { %v98_v19 = vpop.f32.mrf.mxu0 }
 0x102   :  { %v113_v20 = vadd.f32 %v141_v18, %v98_v19 }
 0x103   :  { %v193_v21 = vpop.f32.mrf.mxu0 }
 0x104   :  { %126 = vst [vmem:[#allocation3] sm:$0xff] %v113_v20 }
 0x105   :  { %208 = shalt.err (!%p205_p4)
}
 0x106   :  { %136 = dma.vmem_to_hbm [thread:$0]  %s134_s22, 128, %s302_s3, [#allocation4]  }
 0x107   :  { %217 = dma.done.wait [#allocation4], 128  }
 0x108   :  { %218 = vsyncadd [#allocation4], 4294967168 }
 0x109   :  { %140 = vsyncpa [#allocation4], 1 }

</bundles_post_ra>
